<compile_context>
chip_gen: v5e
topology: v5e:2x2
jax: 0.10.0
libtpu: 0.0.40
codegen_flags: <defaults>
</compile_context>

<pallas_src>
import math
from collections import OrderedDict

import numpy as np
import jax
import jax.numpy as jnp
from jax import lax
from jax.experimental import pallas as pl
from jax.experimental.pallas import tpu as pltpu


# --------------------------------------------------------------------------------------
# Trace-time weight construction (numpy, deterministic)
# --------------------------------------------------------------------------------------
def _build_cascade_kernels_np(kernel_size, sigma):
    """Numpy re-implementation of the module's __init__ weights.

    Returns (3, K, K) float32 — one normalized Gaussian per cascade coefficient
    [0.5, 1.0, 2.0] * sigma.  (The PyTorch module repeats each to (3,1,K,K) for a
    groups=3 depthwise conv; every channel uses the same plane, so (K,K) suffices.)
    """
    if isinstance(kernel_size, (int, float)):
        kernel_size = [int(kernel_size), int(kernel_size)]
    cascade_coefficients = [0.5, 1.0, 2.0]
    sigmas = [[c * sigma, c * sigma] for c in cascade_coefficients]
    grids = np.meshgrid(
        *[np.arange(s, dtype=np.float32) for s in kernel_size], indexing="ij")
    kernels = []
    for sig in sigmas:
        kernel = np.ones_like(grids[0])
        for size_1d, std_1d, grid in zip(kernel_size, sig, grids):
            mean = (size_1d - 1) / 2
            kernel = kernel * (
                1.0 / (std_1d * math.sqrt(2.0 * math.pi))
                * np.exp(-(((grid - mean) / std_1d) ** 2) / 2.0))
        kernel = kernel / np.sum(kernel)
        kernels.append(kernel.astype(np.float32))
    return np.stack(kernels, axis=0)  # (3, K, K)


def _combined_weight_groups(kernel_size, sigma):
    """Fold the cascade ((k1+k2+k3)/3 — exact) and group taps sharing a weight.

    The combined kernel has D4 symmetry, so for K=5 only 6 distinct weights cover
    25 taps: summing each orbit first and multiplying once cuts VALU multiplies ~4x.
    Returns (K, [(weight, [(ki, kj), ...]), ...]) with weights as Python floats.
    """
    kernels = _build_cascade_kernels_np(kernel_size, sigma)
    K = int(kernels.shape[-1])
    combined = (kernels[0] + kernels[1] + kernels[2]) / np.float32(3.0)
    groups = OrderedDict()
    for ki in range(K):
        for kj in range(K):
            groups.setdefault(float(combined[ki, kj]), []).append((ki, kj))
    return K, list(groups.items())


# --------------------------------------------------------------------------------------
# Kernel
# --------------------------------------------------------------------------------------
def _make_band_kernel(weight_groups, K, BAND, W_out, Wp, total_rows):
    """Row-band depthwise Gaussian with manual double-buffered input DMA.

    x_hbm : ANY/HBM ref [NC, total_rows, Wp]   (reflect-padded planes, zero rows below)
    o_ref : VMEM block  [1, BAND, W_out]
    buf   : VMEM scratch [2, BAND+K-1, Wp]     (double-buffered haloed band, input dtype)
    sem   : DMA semaphores (2,)
    """
    band_rows = BAND + K - 1
    max_start = total_rows - band_rows  # == (n_bands - 1) * BAND

    def kernel(x_hbm, o_ref, buf, sem):
        p = pl.program_id(0)          # plane index (parallel axis)
        b = pl.program_id(1)          # band index  (sequential axis)
        nb = pl.num_programs(1)
        slot = lax.rem(b, 2)

        def start_fetch(band_idx, slot_idx):
            start = jnp.minimum(band_idx * BAND, max_start)   # belt-and-braces clamp
            pltpu.make_async_copy(
                x_hbm.at[p, pl.ds(start, band_rows)],
                buf.at[slot_idx],
                sem.at[slot_idx],
            ).start()

        # First band of a plane: nothing prefetched yet — issue its copy now.
        @pl.when(b == 0)
        def _():
            start_fetch(0, 0)

        # Prefetch the next band of this plane while we compute the current one.
        @pl.when(b + 1 < nb)
        def _():
            start_fetch(b + 1, 1 - slot)

        # Wait for the current band (descriptor only needs matching shapes).
        pltpu.make_async_copy(
            x_hbm.at[p, pl.ds(0, band_rows)],
            buf.at[slot],
            sem.at[slot],
        ).wait()

        xp = buf[slot].astype(jnp.float32)                # (band_rows, Wp), cast once
        # Hoist the K lane (column) shifts out of the tap loop: K realignments, not K*K.
        xs = [xp[:, kj:kj + W_out] for kj in range(K)]    # K x (band_rows, W_out)

        # D4-symmetric taps: add the shifted slices of each weight-orbit first,
        # multiply once per orbit, accumulate.
        acc = None
        for w_val, taps in weight_groups:
            ki0, kj0 = taps[0]
            s = xs[kj0][ki0:ki0 + BAND, :]
            for (ki, kj) in taps[1:]:
                s = s + xs[kj][ki:ki + BAND, :]
            term = w_val * s
            acc = term if acc is None else acc + term

        o_ref[0] = acc.astype(o_ref.dtype)

    return kernel


# --------------------------------------------------------------------------------------
# Band sizing (generation-aware)
# --------------------------------------------------------------------------------------
def _choose_band(H_out, Wp, K, vmem_cap):
    """Pick the output row-band height so all band-sized buffers fit comfortably.

    Budget ~1/4 of VMEM across the ~(K+6) band-sized buffers live at once
    (2 input DMA slots, K hoisted lane shifts, accumulator, 2 output blocks, slack).
    """
    budget = vmem_cap // 4
    per_row_bytes = Wp * 4              # f32 working rows dominate
    n_band_buffers = K + 6
    band = budget // max(1, per_row_bytes * n_band_buffers)
    band = max(8, min(int(band), 1024))
    if band >= H_out:
        return H_out                    # single band; block dims == full array dims
    band = (band // 8) * 8              # keep the output block sublane dim 8-aligned
    # Prefer a (not much smaller) divisor of H_out to avoid the final row crop.
    for cand in range(band, max(band // 2, 7), -8):
        if H_out % cand == 0:
            return cand
    return band


# --------------------------------------------------------------------------------------
# Wrapper
# --------------------------------------------------------------------------------------
def cascade_gaussian_smoothing(x, kernel_size, sigma):
    """Forward pass of CascadeGaussianSmoothing.  x: [N, C, H, W] (C=3 in the module)."""
    N, C, H, W = x.shape
    K, weight_groups = _combined_weight_groups(kernel_size, sigma)
    pad = int(K / 2)                                    # matches self.pad

    Hp, Wp = H + 2 * pad, W + 2 * pad
    H_out, W_out = Hp - K + 1, Wp - K + 1               # == H, W for odd K
    NC = N * C

    try:
        vmem_cap = int(pltpu.get_tpu_info().vmem_capacity_bytes)
    except Exception:
        vmem_cap = 64 << 20                             # conservative (v7x per-TC)

    BAND = _choose_band(H_out, Wp, K, vmem_cap)
    n_bands = -(-H_out // BAND)
    band_rows = BAND + K - 1
    total_rows = n_bands * BAND + K - 1                 # rows any band DMA may touch
    H_out_padded = n_bands * BAND

    # Reflect pad (matches F.pad(..., mode='reflect')).  A few extra zero rows at the
    # bottom let every band DMA a fixed (BAND+K-1)-row window with no OOB access; the
    # corresponding output rows are cropped below.  This pad is the only wrapper pass.
    x_flat = x.reshape(NC, H, W)
    x_pad = jnp.pad(x_flat, ((0, 0), (pad, pad), (pad, pad)), mode="reflect")
    if total_rows > Hp:
        x_pad = jnp.pad(x_pad, ((0, 0), (0, total_rows - Hp), (0, 0)))

    in_itemsize = x.dtype.itemsize
    footprint = (2 * band_rows * Wp * in_itemsize                 # input DMA double buffer
                 + (K + 2) * band_rows * Wp * 4                   # f32 cast + hoisted shifts
                 + 2 * BAND * W_out * (in_itemsize + 4))          # output blocks + accumulator
    vmem_limit = int(min(vmem_cap * 3 // 4, max(2 * footprint, 32 << 20)))

    out = pl.pallas_call(
        _make_band_kernel(weight_groups, K, BAND, W_out, Wp, total_rows),
        out_shape=jax.ShapeDtypeStruct((NC, H_out_padded, W_out), x.dtype),
        grid=(NC, n_bands),
        in_specs=[pl.BlockSpec(memory_space=pl.ANY)],             # raw HBM ref, manual band DMA
        out_specs=pl.BlockSpec((1, BAND, W_out), lambda p, b: (p, b, 0)),
        scratch_shapes=[
            pltpu.VMEM((2, band_rows, Wp), x.dtype),              # double-buffered haloed band
            pltpu.SemaphoreType.DMA((2,)),
        ],
        compiler_params=pltpu.CompilerParams(
            dimension_semantics=("parallel", "arbitrary"),
            vmem_limit_bytes=vmem_limit,
        ),
    )(x_pad)

    if H_out_padded != H_out:
        out = out[:, :H_out, :]
    return out.reshape(N, C, H_out, W_out)


# --------------------------------------------------------------------------------------
# Pure-JAX reference (mirrors the PyTorch forward exactly: 3 depthwise convs, then avg)
# --------------------------------------------------------------------------------------
def _reference(x, kernel_size, sigma):
    N, C, H, W = x.shape
    kernels = jnp.asarray(_build_cascade_kernels_np(kernel_size, sigma))  # (3, K, K)
    K = int(kernels.shape[-1])
    pad = int(K / 2)
    x_pad = jnp.pad(
        x.astype(jnp.float32),
        ((0, 0), (0, 0), (pad, pad), (pad, pad)),
        mode="reflect",
    )
    grads = []
    for i in range(3):
        w = jnp.tile(kernels[i][None, None], (C, 1, 1, 1))   # (C,1,K,K) depthwise
        g = lax.conv_general_dilated(
            x_pad, w, window_strides=(1, 1), padding="VALID",
            dimension_numbers=("NCHW", "OIHW", "NCHW"),
            feature_group_count=C,
        )
        grads.append(g)
    return (grads[0] + grads[1] + grads[2]) / 3.0


if __name__ == "__main__":
    # The PyTorch module hard-codes 3 channels (weight.repeat(3,1,1,1), groups=C).
    N, C, H, W = 2, 3, 16, 16
    kernel_size = 5
    sigma = 2.0

    key = jax.random.PRNGKey(0)
    x = jax.random.normal(key, (N, C, H, W), dtype=jnp.float32)

    out = cascade_gaussian_smoothing(x, kernel_size, sigma)
    out = jax.block_until_ready(out)

    ref = jax.block_until_ready(_reference(x, kernel_size, sigma))
    assert out.shape == ref.shape == (N, C, H, W)
    assert jnp.allclose(out.astype(jnp.float32), ref, rtol=1e-5, atol=1e-5)

    print("KERNEL_OK")
</pallas_src>

<mosaic_0001>
module attributes {stable_mosaic.version = 11 : i64} {
  func.func @kernel(%arg0: i32, %arg1: i32, %arg2: memref<6x20x20xf32, #tpu.memory_space<any>>, %arg3: memref<1x16x16xf32, #tpu.memory_space<vmem>>, %arg4: memref<2x20x20xf32, #tpu.memory_space<vmem>>, %arg5: memref<2x!tpu.dma_semaphore, #tpu.memory_space<semaphore_mem>>) attributes {dimension_semantics = [#tpu.dimension_semantics<parallel>, #tpu.dimension_semantics<arbitrary>], iteration_bounds = array<i64: 6, 1>, scalar_prefetch = 0 : i64, scratch_operands = 2 : i64, tpu.core_type = #tpu.core_type<tc>, window_params = [{}, {transform_indices = @transform_1, window_bounds = array<i64: 1, 16, 16>}]} {
    %c2_i32 = arith.constant 2 : i32
    %0 = arith.remsi %arg1, %c2_i32 : i32
    %c0_i32 = arith.constant 0 : i32
    %1 = arith.cmpi eq, %arg1, %c0_i32 : i32
    %2 = arith.extui %1 : i1 to i32
    %c0_i32_0 = arith.constant 0 : i32
    %3 = arith.cmpi ne, %2, %c0_i32_0 : i32
    scf.if %3 {
      %c0_i32_16 = arith.constant 0 : i32
      %c0_i32_17 = arith.constant 0 : i32
      %86 = arith.minsi %c0_i32_16, %c0_i32_17 : i32
      %c0_i32_18 = arith.constant 0 : i32
      %c0_i32_19 = arith.constant 0 : i32
      %c0_i32_20 = arith.constant 0 : i32
      %87 = tpu.memref_slice %arg2[%arg0, %86, %c0_i32_20] : memref<6x20x20xf32, #tpu.memory_space<any>> -> memref<1x20x20xf32, #tpu.memory_space<any>>
      %88 = tpu.memref_squeeze %87 : memref<1x20x20xf32, #tpu.memory_space<any>> -> memref<20x20xf32, #tpu.memory_space<any>>
      %c0_i32_21 = arith.constant 0 : i32
      %c0_i32_22 = arith.constant 0 : i32
      %89 = tpu.memref_slice %arg4[%c0_i32_18, %c0_i32_21, %c0_i32_22] : memref<2x20x20xf32, #tpu.memory_space<vmem>> -> memref<1x20x20xf32, #tpu.memory_space<vmem>>
      %90 = tpu.memref_squeeze %89 : memref<1x20x20xf32, #tpu.memory_space<vmem>> -> memref<20x20xf32, #tpu.memory_space<vmem>>
      %91 = tpu.memref_slice %arg5[%c0_i32_19] : memref<2x!tpu.dma_semaphore, #tpu.memory_space<semaphore_mem>> -> memref<1x!tpu.dma_semaphore, #tpu.memory_space<semaphore_mem>>
      %92 = tpu.memref_squeeze %91 : memref<1x!tpu.dma_semaphore, #tpu.memory_space<semaphore_mem>> -> memref<!tpu.dma_semaphore, #tpu.memory_space<semaphore_mem>>
      tpu.enqueue_dma source(%88 : memref<20x20xf32, #tpu.memory_space<any>>) target(%90 : memref<20x20xf32, #tpu.memory_space<vmem>>) target_semaphore(%92 : memref<!tpu.dma_semaphore, #tpu.memory_space<semaphore_mem>>)
    } else {
    }
    %c1_i32 = arith.constant 1 : i32
    %4 = arith.addi %arg1, %c1_i32 : i32
    %c1_i32_1 = arith.constant 1 : i32
    %5 = arith.cmpi slt, %4, %c1_i32_1 : i32
    %6 = arith.extui %5 : i1 to i32
    %c0_i32_2 = arith.constant 0 : i32
    %7 = arith.cmpi ne, %6, %c0_i32_2 : i32
    scf.if %7 {
      %c1_i32_16 = arith.constant 1 : i32
      %86 = arith.addi %arg1, %c1_i32_16 : i32
      %c1_i32_17 = arith.constant 1 : i32
      %87 = arith.subi %c1_i32_17, %0 : i32
      %c16_i32 = arith.constant 16 : i32
      %88 = arith.muli %86, %c16_i32 : i32
      %c0_i32_18 = arith.constant 0 : i32
      %89 = arith.minsi %88, %c0_i32_18 : i32
      %c0_i32_19 = arith.constant 0 : i32
      %90 = tpu.memref_slice %arg2[%arg0, %89, %c0_i32_19] : memref<6x20x20xf32, #tpu.memory_space<any>> -> memref<1x20x20xf32, #tpu.memory_space<any>>
      %91 = tpu.memref_squeeze %90 : memref<1x20x20xf32, #tpu.memory_space<any>> -> memref<20x20xf32, #tpu.memory_space<any>>
      %c0_i32_20 = arith.constant 0 : i32
      %c0_i32_21 = arith.constant 0 : i32
      %92 = tpu.memref_slice %arg4[%87, %c0_i32_20, %c0_i32_21] : memref<2x20x20xf32, #tpu.memory_space<vmem>> -> memref<1x20x20xf32, #tpu.memory_space<vmem>>
      %93 = tpu.memref_squeeze %92 : memref<1x20x20xf32, #tpu.memory_space<vmem>> -> memref<20x20xf32, #tpu.memory_space<vmem>>
      %94 = tpu.memref_slice %arg5[%87] : memref<2x!tpu.dma_semaphore, #tpu.memory_space<semaphore_mem>> -> memref<1x!tpu.dma_semaphore, #tpu.memory_space<semaphore_mem>>
      %95 = tpu.memref_squeeze %94 : memref<1x!tpu.dma_semaphore, #tpu.memory_space<semaphore_mem>> -> memref<!tpu.dma_semaphore, #tpu.memory_space<semaphore_mem>>
      tpu.enqueue_dma source(%91 : memref<20x20xf32, #tpu.memory_space<any>>) target(%93 : memref<20x20xf32, #tpu.memory_space<vmem>>) target_semaphore(%95 : memref<!tpu.dma_semaphore, #tpu.memory_space<semaphore_mem>>)
    } else {
    }
    %c0_i32_3 = arith.constant 0 : i32
    %c0_i32_4 = arith.constant 0 : i32
    %8 = tpu.memref_slice %arg2[%arg0, %c0_i32_3, %c0_i32_4] : memref<6x20x20xf32, #tpu.memory_space<any>> -> memref<1x20x20xf32, #tpu.memory_space<any>>
    %9 = tpu.memref_squeeze %8 : memref<1x20x20xf32, #tpu.memory_space<any>> -> memref<20x20xf32, #tpu.memory_space<any>>
    %c0_i32_5 = arith.constant 0 : i32
    %c0_i32_6 = arith.constant 0 : i32
    %10 = tpu.memref_slice %arg4[%0, %c0_i32_5, %c0_i32_6] : memref<2x20x20xf32, #tpu.memory_space<vmem>> -> memref<1x20x20xf32, #tpu.memory_space<vmem>>
    %11 = tpu.memref_squeeze %10 : memref<1x20x20xf32, #tpu.memory_space<vmem>> -> memref<20x20xf32, #tpu.memory_space<vmem>>
    %12 = tpu.memref_slice %arg5[%0] : memref<2x!tpu.dma_semaphore, #tpu.memory_space<semaphore_mem>> -> memref<1x!tpu.dma_semaphore, #tpu.memory_space<semaphore_mem>>
    %13 = tpu.memref_squeeze %12 : memref<1x!tpu.dma_semaphore, #tpu.memory_space<semaphore_mem>> -> memref<!tpu.dma_semaphore, #tpu.memory_space<semaphore_mem>>
    tpu.wait_dma2 semaphore(%13 : memref<!tpu.dma_semaphore, #tpu.memory_space<semaphore_mem>>) src(%9 : memref<20x20xf32, #tpu.memory_space<any>>) dst(%11 : memref<20x20xf32, #tpu.memory_space<vmem>>)
    %14 = arith.index_cast %0 : i32 to index
    %c0 = arith.constant 0 : index
    %c0_7 = arith.constant 0 : index
    %15 = vector.load %arg4[%14, %c0, %c0_7] : memref<2x20x20xf32, #tpu.memory_space<vmem>>, vector<1x20x20xf32>
    %16 = vector.shape_cast %15 : vector<1x20x20xf32> to vector<20x20xf32>
    %17 = vector.extract_strided_slice %16 {offsets = [0, 0], sizes = [20, 16], strides = [1, 1]} : vector<20x20xf32> to vector<20x16xf32>
    %18 = vector.extract_strided_slice %16 {offsets = [0, 1], sizes = [20, 16], strides = [1, 1]} : vector<20x20xf32> to vector<20x16xf32>
    %19 = vector.extract_strided_slice %16 {offsets = [0, 2], sizes = [20, 16], strides = [1, 1]} : vector<20x20xf32> to vector<20x16xf32>
    %20 = vector.extract_strided_slice %16 {offsets = [0, 3], sizes = [20, 16], strides = [1, 1]} : vector<20x20xf32> to vector<20x16xf32>
    %21 = vector.extract_strided_slice %16 {offsets = [0, 4], sizes = [20, 16], strides = [1, 1]} : vector<20x20xf32> to vector<20x16xf32>
    %22 = vector.extract_strided_slice %17 {offsets = [0, 0], sizes = [16, 16], strides = [1, 1]} : vector<20x16xf32> to vector<16x16xf32>
    %23 = vector.extract_strided_slice %21 {offsets = [0, 0], sizes = [16, 16], strides = [1, 1]} : vector<20x16xf32> to vector<16x16xf32>
    %24 = arith.addf %22, %23 : vector<16x16xf32>
    %25 = vector.extract_strided_slice %17 {offsets = [4, 0], sizes = [16, 16], strides = [1, 1]} : vector<20x16xf32> to vector<16x16xf32>
    %26 = arith.addf %24, %25 : vector<16x16xf32>
    %27 = vector.extract_strided_slice %21 {offsets = [4, 0], sizes = [16, 16], strides = [1, 1]} : vector<20x16xf32> to vector<16x16xf32>
    %28 = arith.addf %26, %27 : vector<16x16xf32>
    %cst = arith.constant 0.0204732716 : f32
    %29 = vector.broadcast %cst : f32 to vector<16x16xf32>
    %30 = arith.mulf %29, %28 : vector<16x16xf32>
    %31 = vector.extract_strided_slice %18 {offsets = [0, 0], sizes = [16, 16], strides = [1, 1]} : vector<20x16xf32> to vector<16x16xf32>
    %32 = vector.extract_strided_slice %20 {offsets = [0, 0], sizes = [16, 16], strides = [1, 1]} : vector<20x16xf32> to vector<16x16xf32>
    %33 = arith.addf %31, %32 : vector<16x16xf32>
    %34 = vector.extract_strided_slice %17 {offsets = [1, 0], sizes = [16, 16], strides = [1, 1]} : vector<20x16xf32> to vector<16x16xf32>
    %35 = arith.addf %33, %34 : vector<16x16xf32>
    %36 = vector.extract_strided_slice %21 {offsets = [1, 0], sizes = [16, 16], strides = [1, 1]} : vector<20x16xf32> to vector<16x16xf32>
    %37 = arith.addf %35, %36 : vector<16x16xf32>
    %38 = vector.extract_strided_slice %17 {offsets = [3, 0], sizes = [16, 16], strides = [1, 1]} : vector<20x16xf32> to vector<16x16xf32>
    %39 = arith.addf %37, %38 : vector<16x16xf32>
    %40 = vector.extract_strided_slice %21 {offsets = [3, 0], sizes = [16, 16], strides = [1, 1]} : vector<20x16xf32> to vector<16x16xf32>
    %41 = arith.addf %39, %40 : vector<16x16xf32>
    %42 = vector.extract_strided_slice %18 {offsets = [4, 0], sizes = [16, 16], strides = [1, 1]} : vector<20x16xf32> to vector<16x16xf32>
    %43 = arith.addf %41, %42 : vector<16x16xf32>
    %44 = vector.extract_strided_slice %20 {offsets = [4, 0], sizes = [16, 16], strides = [1, 1]} : vector<20x16xf32> to vector<16x16xf32>
    %45 = arith.addf %43, %44 : vector<16x16xf32>
    %cst_8 = arith.constant 0.0285980459 : f32
    %46 = vector.broadcast %cst_8 : f32 to vector<16x16xf32>
    %47 = arith.mulf %46, %45 : vector<16x16xf32>
    %48 = arith.addf %30, %47 : vector<16x16xf32>
    %49 = vector.extract_strided_slice %19 {offsets = [0, 0], sizes = [16, 16], strides = [1, 1]} : vector<20x16xf32> to vector<16x16xf32>
    %50 = vector.extract_strided_slice %17 {offsets = [2, 0], sizes = [16, 16], strides = [1, 1]} : vector<20x16xf32> to vector<16x16xf32>
    %51 = arith.addf %49, %50 : vector<16x16xf32>
    %52 = vector.extract_strided_slice %21 {offsets = [2, 0], sizes = [16, 16], strides = [1, 1]} : vector<20x16xf32> to vector<16x16xf32>
    %53 = arith.addf %51, %52 : vector<16x16xf32>
    %54 = vector.extract_strided_slice %19 {offsets = [4, 0], sizes = [16, 16], strides = [1, 1]} : vector<20x16xf32> to vector<16x16xf32>
    %55 = arith.addf %53, %54 : vector<16x16xf32>
    %cst_9 = arith.constant 0.0333856978 : f32
    %56 = vector.broadcast %cst_9 : f32 to vector<16x16xf32>
    %57 = arith.mulf %56, %55 : vector<16x16xf32>
    %58 = arith.addf %48, %57 : vector<16x16xf32>
    %59 = vector.extract_strided_slice %18 {offsets = [1, 0], sizes = [16, 16], strides = [1, 1]} : vector<20x16xf32> to vector<16x16xf32>
    %60 = vector.extract_strided_slice %20 {offsets = [1, 0], sizes = [16, 16], strides = [1, 1]} : vector<20x16xf32> to vector<16x16xf32>
    %61 = arith.addf %59, %60 : vector<16x16xf32>
    %62 = vector.extract_strided_slice %18 {offsets = [3, 0], sizes = [16, 16], strides = [1, 1]} : vector<20x16xf32> to vector<16x16xf32>
    %63 = arith.addf %61, %62 : vector<16x16xf32>
    %64 = vector.extract_strided_slice %20 {offsets = [3, 0], sizes = [16, 16], strides = [1, 1]} : vector<20x16xf32> to vector<16x16xf32>
    %65 = arith.addf %63, %64 : vector<16x16xf32>
    %cst_10 = arith.constant 0.0504373051 : f32
    %66 = vector.broadcast %cst_10 : f32 to vector<16x16xf32>
    %67 = arith.mulf %66, %65 : vector<16x16xf32>
    %68 = arith.addf %58, %67 : vector<16x16xf32>
    %69 = vector.extract_strided_slice %19 {offsets = [1, 0], sizes = [16, 16], strides = [1, 1]} : vector<20x16xf32> to vector<16x16xf32>
    %70 = vector.extract_strided_slice %18 {offsets = [2, 0], sizes = [16, 16], strides = [1, 1]} : vector<20x16xf32> to vector<16x16xf32>
    %71 = arith.addf %69, %70 : vector<16x16xf32>
    %72 = vector.extract_strided_slice %20 {offsets = [2, 0], sizes = [16, 16], strides = [1, 1]} : vector<20x16xf32> to vector<16x16xf32>
    %73 = arith.addf %71, %72 : vector<16x16xf32>
    %74 = vector.extract_strided_slice %19 {offsets = [3, 0], sizes = [16, 16], strides = [1, 1]} : vector<20x16xf32> to vector<16x16xf32>
    %75 = arith.addf %73, %74 : vector<16x16xf32>
    %cst_11 = arith.constant 0.0659662113 : f32
    %76 = vector.broadcast %cst_11 : f32 to vector<16x16xf32>
    %77 = arith.mulf %76, %75 : vector<16x16xf32>
    %78 = arith.addf %68, %77 : vector<16x16xf32>
    %79 = vector.extract_strided_slice %19 {offsets = [2, 0], sizes = [16, 16], strides = [1, 1]} : vector<20x16xf32> to vector<16x16xf32>
    %cst_12 = arith.constant 0.090165697 : f32
    %80 = vector.broadcast %cst_12 : f32 to vector<16x16xf32>
    %81 = arith.mulf %80, %79 : vector<16x16xf32>
    %82 = arith.addf %78, %81 : vector<16x16xf32>
    %c0_13 = arith.constant 0 : index
    %c0_14 = arith.constant 0 : index
    %c0_15 = arith.constant 0 : index
    %83 = vector.load %arg3[%c0_13, %c0_14, %c0_15] : memref<1x16x16xf32, #tpu.memory_space<vmem>>, vector<1x16x16xf32>
    %84 = vector.shape_cast %83 : vector<1x16x16xf32> to vector<16x16xf32>
    %85 = vector.shape_cast %82 : vector<16x16xf32> to vector<1x16x16xf32>
    tpu.vector_store %arg3[%c0_13, %c0_14, %c0_15], %85 {strides = array<i32>} : memref<1x16x16xf32, #tpu.memory_space<vmem>>, vector<1x16x16xf32>,
    return
  }
  func.func @transform_1(%arg0: i32, %arg1: i32) -> (i32, i32, i32) {
    %c0_i32 = arith.constant 0 : i32
    %c0_i32_0 = arith.constant 0 : i32
    return %arg0, %arg1, %c0_i32 : i32, i32, i32
  }
}

</mosaic_0001>

<bundles_post_ra>
// kernel: tpu_custom_call.1
= control target key start
LH: loop header
LB: loop body
LE: loop exit
PB: predicated region body
PF: predicated region fallthrough
CT: control target
= control target key end

     0   :  { %6 = vsyncpa [#allocation5], 0  ;;  %s808_s0 = inlined_call_operand.hbm [shape: f32[6,20,20], index: 0, kind: input, shape index: {}]   ;;  %s809_s1 = inlined_call_operand.hbm [shape: f32[6,16,16], index: 1, kind: output, shape index: {}]  }
   0x1   :  { %8 = vsyncpa [#allocation5 + $0x1], 0  ;;  %s623_s6 = smov 0   ;;  %s625_s7 = smov 0  }
   0x2   :  { %s627_s8 = smov 0   ;;  %s629_s9 = smov 0  }
   0x3 LB: > { %s23_s10 = sadd.s32 1, %s598_s8  ;;  %s454_s11 = sadd.s32 4294967295, %s602_s9   ;;  %s602_s9 = sphi %s629_s9, %s14_s9   ;;  %s598_s8 = sphi %s627_s8, %s814_s8   ;;  %s594_s7 = sphi %s625_s7, %s813_s7   ;;  %s590_s6 = sphi %s623_s6, %s812_s6  }
   0x4   : > { %p25_p0 = scmp.ge.s32.totalorder %s23_s10, 6  ;;  %p41_p1 = scmp.ne.s32.totalorder %s594_s7, %s590_s6 }
   0x5   : > { %s32_s12 = sadd.s32 1, %s594_s7  ;;  %p42_p2 = scmp.eq.s32.totalorder %s454_s11, 5 }
   0x6   : > { %s816_s10 = smov (%p25_p0, %s23_s10), 0  ;;  %p36_p3 = scmp.eq.s32.totalorder %s602_s9, 5 }
   0x7   : > { %s27_s13 = ssub.s32 %s598_s8, %s816_s10  ;;  %p653_p6 = por %p42_p2, %p41_p1 }
   0x8   : > { %p30_p4 = scmp.eq.s32.totalorder %s27_s13, 0  ;;  %p455_p5 = scmp.ne.s32.totalorder %s27_s13, 0 }
   0x9   : > { %p456_p8 = scmp.ge.s32.totalorder %s602_s9, 6 }
   0xa   : > { %s658_s15 = scalar_select %p30_p4, %s594_s7, %s32_s12  }
   0xb   : > { %p660_p7 = por %p455_p5, %p36_p3  ;;  %51 = sbr.rel (%p456_p8) target bundleno = 321 (0x141), region = 12 }
   0xc   : > { %s56_s17 = sand.u32 (!%p456_p8), 1, %s594_s7   ;;  %s70_s18 = smul.u32 (!%p456_p8), 24, %s598_s8 }
   0xd   : > { %s457_s19 = sshll.u32 (!%p456_p8), %s56_s17, 4  ;;  %s604_s24 = smov (!%p456_p8), [#allocation2]  }
   0xe   : > { %s71_s22 = scalar_lea.hbm (!%p456_p8), %s808_s0, %s70_s18  ;;  %s81_s25 = sshll.u32 (!%p456_p8), %s604_s24, 4  ;;  %s82_s25 = int_to_ptr.vmem [resolvable:$true] %s81_s25 }
   0xf   : > { %s79_s23 = sshll.u32 (!%p456_p8), %s71_s22, 4  ;;  %s672_s26 = scalar_lea.vmem (!%p456_p8), [#allocation4], %s457_s19  ;;  %s80_s23 = int_to_ptr.hbm [resolvable:$true] %s79_s23 }
  0x10   : > { %84 = dma.hbm_to_vmem [thread:$0]  %s80_s23, 320, %s82_s25, [#allocation3] }
  0x11   : > { %582 = dma.done.wait [#allocation3], 320 }
  0x12   : > { %583 = vsyncadd [#allocation3], 4294966976  ;;  %v674_v0 = vld [vmem:[#allocation2] sm:$0xff]  ;;  %v676_v1 = vld [vmem:[#allocation2 + $0x8] sm:$0xff]  ;;  %vm161_vm0 = vcmask 1046528   ;;  %s605_s27 = smov 126  }
  0x13   : > { %153 = vrot.lane.b32.xlu0 %v674_v0, %s605_s27  ;;  %v162_v2 = vrot.slane %v674_v0, 1  ;;  %v163_v3 = vrot.slane %v676_v1, 1  ;;  %v682_v4 = vld [vmem:[#allocation2 + $0x10] sm:$0xf]  ;;  %s606_s28 = smov 125   ;;  %s607_s29 = smov 1  }
  0x14   : > { %v165_v6 = vrot.slane %v682_v4, 1  ;;  %v184_v8 = vrot.slane %v674_v0, 3  ;;  %v185_v9 = vrot.slane %v676_v1, 3  ;;  %vm183_vm1 = vcmask 1044480   ;;  %s608_s30 = smov 2   ;;  %s609_s2 = smov 127  }
  0x15   : > { %v164_v5 = vsel %vm161_vm0, %v162_v2, %v163_v3  ;;  %v187_v10 = vrot.slane %v682_v4, 3  ;;  %v228_v13 = vrot.slane %v674_v0, 2  ;;  %v229_v14 = vrot.slane %v676_v1, 2  ;;  %s610_s3 = smov 124   ;;  %s465_s4 = sshll.u32 %s598_s8, 4 }
  0x16   : > { %175 = vrot.lane.b32.xlu2 %v164_v5, %s606_s28  ;;  %167 = vrot.lane.b32.xlu1 %v164_v5, %s607_s29  ;;  %v166_v7 = vsel %vm161_vm0, %v163_v3, %v165_v6  ;;  %v186_v11 = vsel %vm183_vm1, %v184_v8, %v185_v9  ;;  %vm227_vm2 = vcmask 1045504   ;;  %v702_v16 = vrot.slane %v682_v4, 2  ;;  %s374_s12 = scalar_lea.hbm %s809_s1, %s465_s4  ;;  %s375_s13 = sshll.u32 %s672_s26, 4  ;;  %s376_s13 = int_to_ptr.vmem [resolvable:$true] %s375_s13 }
  0x17   : > { %v188_v12 = vsel %vm183_vm1, %v185_v9, %v187_v10  ;;  %v699_v15 = vsel %vm227_vm2, %v228_v13, %v229_v14  ;;  %v134_v17 = vrot.slane %v674_v0, 4  ;;  %v135_v18 = vrot.slane %v676_v1, 4  ;;  %s377_s18 = sshll.u32 %s374_s12, 4  ;;  %s361_s8 = scalar_lea.sflag [#allocation5], %s56_s17  ;;  %s378_s18 = int_to_ptr.hbm [resolvable:$true] %s377_s18 }
  0x18   : > { %v711_v19 = vsel %vm227_vm2, %v229_v14, %v702_v16  ;;  %vm133_vm3 = vcmask 1043456   ;;  %v137_v21 = vrot.slane %v682_v4, 4  ;;  %vm357_vm4 = vcmask 130048   ;;  %s611_s19 = smov 128   ;;  %s612_s20 = smov 8  }
  0x19   : > { %v714_v20 = vsel %vm133_vm3, %v134_v17, %v135_v18 }
  0x1a   : > { %v720_v22 = vsel %vm133_vm3, %v135_v18, %v137_v21 }
  0x1b   : > { %155 = vrot.lane.b32.xlu0 %v676_v1, %s605_s27 }
  0x1e   : > { %177 = vrot.lane.b32.xlu2 %v166_v7, %s606_s28  ;;  %169 = vrot.lane.b32.xlu1 %v166_v7, %s607_s29 }
  0x23   : > { %189 = vrot.lane.b32.xlu0 %v186_v11, %s607_s29 }
  0x26   : > { %197 = vrot.lane.b32.xlu2 %v186_v11, %s606_s28  ;;  %191 = vrot.lane.b32.xlu1 %v188_v12, %s607_s29 }
  0x2b   : > { %199 = vrot.lane.b32.xlu0 %v188_v12, %s606_s28 }
  0x2e   : > { %233 = vrot.lane.b32.xlu2 %v699_v15, %s608_s30  ;;  %263 = vrot.lane.b32.xlu1 %v682_v4, %s605_s27 }
  0x33   : > { %235 = vrot.lane.b32.xlu0 %v711_v19, %s608_s30 }
  0x36   : > { %298 = vrot.lane.b32.xlu1 %v165_v6, %s607_s29  ;;  %207 = vrot.lane.b32.xlu2 %v714_v20, %s605_s27 }
  0x3b   : > { %209 = vrot.lane.b32.xlu0 %v720_v22, %s605_s27 }
  0x3e   : > { %241 = vrot.lane.b32.xlu1 %v699_v15, %s605_s27  ;;  %243 = vrot.lane.b32.xlu2 %v711_v19, %s605_s27 }
  0x43   : > { %273 = vrot.lane.b32.xlu0 %v702_v16, %s605_s27 }
  0x46   : > { %304 = vrot.lane.b32.xlu1 %v164_v5, %s609_s2  ;;  %306 = vrot.lane.b32.xlu2 %v166_v7, %s609_s2 }
  0x4b   : > { %308 = vrot.lane.b32.xlu0 %v165_v6, %s609_s2 }
  0x4e   : > { %124 = vrot.lane.b32.xlu1 %v674_v0, %s610_s3  ;;  %126 = vrot.lane.b32.xlu2 %v676_v1, %s610_s3 }
  0x53   : > { %143 = vrot.lane.b32.xlu0 %v714_v20, %s610_s3 }
  0x56   : > { %145 = vrot.lane.b32.xlu1 %v720_v22, %s610_s3 }
  0x70   : > { %v176_v23 = vpop.permute.xlu2 %175 }
  0x78   : > { %v178_v24 = vpop.permute.xlu2 %177 }
  0x80   : > { %v198_v26 = vpop.permute.xlu2 %197 }
  0x85   : > { %v154_v25 = vpop.permute.xlu0 %153 }
  0x86   : > { %v159_v43 = vadd.f32 %v154_v25, %v674_v0 }
  0x88   : > { %v168_v27 = vpop.permute.xlu1 %167  ;;  %v234_v30 = vpop.permute.xlu2 %233  ;;  %v270_v49 = vadd.f32 %v699_v15, %v159_v43 }
  0x89   : > { %v239_v50 = vadd.f32 %v234_v30, %v674_v0  ;;  %v173_v59 = vadd.f32 %v168_v27, %v159_v43  ;;  %v301_v11 = vadd.f32 %v168_v27, %v674_v0  ;;  %v338_v30 = vmul.f32 0.0901657, %v674_v0 }
  0x8b   : > { %v181_v9 = vadd.f32 %v176_v23, %v173_v59 }
  0x8d   : > { %v156_v28 = vpop.permute.xlu0 %155 }
  0x8e   : > { %v160_v39 = vadd.f32 %v156_v28, %v676_v1 }
  0x90   : > { %v170_v29 = vpop.permute.xlu1 %169  ;;  %v737_v33 = vpop.permute.xlu2 %207  ;;  %v271_v44 = vadd.f32 %v711_v19, %v160_v39 }
  0x91   : > { %v174_v45 = vadd.f32 %v170_v29, %v160_v39  ;;  %v302_v55 = vadd.f32 %v170_v29, %v676_v1 }
  0x93   : > { %v182_v51 = vadd.f32 %v178_v24, %v174_v45 }
  0x95   : > { %v190_v31 = vpop.permute.xlu0 %189 }
  0x96   : > { %v195_v14 = vadd.f32 %v190_v31, %v181_v9 }
  0x98   : > { %v192_v32 = vpop.permute.xlu1 %191  ;;  %v244_v37 = vpop.permute.xlu2 %243  ;;  %v203_v27 = vadd.f32 %v198_v26, %v195_v14  ;;  %v344_v26 = vrot.slane %v338_v30, 2 }
  0x99   : > { %v277_v47 = vadd.f32 %v271_v44, %v244_v37  ;;  %v196_v60 = vadd.f32 %v192_v32, %v182_v51  ;;  %v339_v32 = vmul.f32 0.0901657, %v676_v1 }
  0x9b   : > { %v280_v56 = vmul.f32 0.050437305, %v277_v47 }
  0x9d   : > { %v200_v34 = vpop.permute.xlu0 %199  ;;  %v286_v5 = vrot.slane %v280_v56, 1 }
  0x9e   : > { %v204_v2 = vadd.f32 %v200_v34, %v196_v60 }
  0xa0   : > { %v264_v35 = vpop.permute.xlu1 %263  ;;  %v307_v53 = vpop.permute.xlu2 %306  ;;  %v206_v17 = vadd.f32 %v204_v2, %v720_v22 }
  0xa1   : > { %v266_v52 = vadd.f32 %v264_v35, %v682_v4  ;;  %v314_v61 = vadd.f32 %v307_v53, %v302_v55 }
  0xa3   : > { %v272_v3 = vadd.f32 %v266_v52, %v702_v16  ;;  %v317_v12 = vadd.f32 %v314_v61, %v711_v19 }
  0xa5   : > { %v236_v36 = vpop.permute.xlu0 %235  ;;  %v320_v23 = vmul.f32 0.06596621, %v317_v12 }
  0xa6   : > { %v240_v38 = vadd.f32 %v236_v36, %v676_v1 }
  0xa8   : > { %v248_v40 = vadd.f32 %v244_v37, %v240_v38  ;;  %v299_v41 = vpop.permute.xlu1 %298  ;;  %v326_v38 = vrot.slane %v320_v23, 1  ;;  %v127_v51 = vpop.permute.xlu2 %126 }
  0xa9   : > { %v303_v19 = vadd.f32 %v299_v41, %v682_v4  ;;  %v345_v41 = vrot.slane %v339_v32, 2 }
  0xaa   : > { %v250_v42 = vadd.f32 %v248_v40, %v720_v22  ;;  %v205_v40 = vadd.f32 %v203_v27, %v714_v20 }
  0xab   : > { %v346_v45 = vsel %vm227_vm2, %v344_v26, %v345_v41 }
  0xac   : > { %v252_v46 = vmul.f32 0.033385698, %v250_v42 }
  0xad   : > { %v210_v48 = vpop.permute.xlu0 %209 }
  0xae   : > { %257 = vrot.lane.b32.xlu2 %v252_v46, %s605_s27  ;;  %v214_v25 = vadd.f32 %v210_v48, %v206_v17  ;;  %v213_v46 = vadd.f32 %v737_v33, %v205_v40 }
  0xb0   : > { %v242_v54 = vpop.permute.xlu1 %241  ;;  %v216_v35 = vmul.f32 0.028598046, %v214_v25  ;;  %v215_v48 = vmul.f32 0.028598046, %v213_v46 }
  0xb1   : > { %v247_v57 = vadd.f32 %v242_v54, %v239_v50  ;;  %v276_v58 = vadd.f32 %v270_v49, %v242_v54 }
  0xb3   : > { %v249_v62 = vadd.f32 %v247_v57, %v714_v20  ;;  %v279_v63 = vmul.f32 0.050437305, %v276_v58  ;;  %v131_v57 = vadd.f32 %v127_v51, %v676_v1 }
  0xb5   : > { %v285_v6 = vrot.slane %v279_v63, 1  ;;  %v274_v7 = vpop.permute.xlu0 %273  ;;  %v251_v8 = vmul.f32 0.033385698, %v249_v62  ;;  %v142_v59 = vadd.f32 %v720_v22, %v131_v57 }
  0xb6   : > { %v278_v10 = vadd.f32 %v274_v7, %v272_v3 }
  0xb7   : > { %255 = vrot.lane.b32.xlu1 %v251_v8, %s605_s27  ;;  %v287_v13 = vsel %vm161_vm0, %v285_v6, %v286_v5 }
  0xb8   : > { %v281_v18 = vmul.f32 0.050437305, %v278_v10  ;;  %v305_v21 = vpop.permute.xlu1 %304  ;;  %290 = vrot.lane.b32.xlu0 %v287_v13, %s609_s2 }
  0xb9   : > { %v313_v24 = vadd.f32 %v305_v21, %v301_v11 }
  0xba   : > { %v288_v28 = vrot.slane %v281_v18, 1 }
  0xbb   : > { %v316_v29 = vadd.f32 %v313_v24, %v699_v15 }
  0xbc   : > { %v289_v37 = vsel %vm161_vm0, %v286_v5, %v288_v28 }
  0xbd   : > { %v319_v31 = vmul.f32 0.06596621, %v316_v29  ;;  %v309_v34 = vpop.permute.xlu0 %308 }
  0xbe   : > { %v315_v36 = vadd.f32 %v309_v34, %v303_v19 }
  0xbf   : > { %v325_v39 = vrot.slane %v319_v31, 1  ;;  %292 = vrot.lane.b32.xlu1 %v289_v37, %s609_s2 }
  0xc0   : > { %v318_v15 = vadd.f32 %v315_v36, %v702_v16  ;;  %221 = vrot.lane.b32.xlu0 %v216_v35, %s609_s2  ;;  %v340_v16 = vmul.f32 0.0901657, %v682_v4  ;;  %v125_v52 = vpop.permute.xlu1 %124 }
  0xc1   : > { %v327_v42 = vsel %vm161_vm0, %v325_v39, %v326_v38  ;;  %v130_v33 = vadd.f32 %v125_v52, %v674_v0 }
  0xc2   : > { %v321_v43 = vmul.f32 0.06596621, %v318_v15  ;;  %330 = vrot.lane.b32.xlu2 %v327_v42, %s605_s27  ;;  %v347_v49 = vrot.slane %v340_v16, 2 }
  0xc3   : > { %v141_v4 = vadd.f32 %v714_v20, %v130_v33 }
  0xc4   : > { %v328_v44 = vrot.slane %v321_v43, 1  ;;  %v348_v50 = vsel %vm227_vm2, %v345_v41, %v347_v49 }
  0xc5   : > { %v144_v56 = vpop.permute.xlu0 %143 }
  0xc6   : > { %v329_v47 = vsel %vm161_vm0, %v326_v38, %v328_v44  ;;  %v149_v58 = vadd.f32 %v144_v56, %v141_v4 }
  0xc7   : > { %349 = vrot.lane.b32.xlu1 %v346_v45, %s605_s27 }
  0xc8   : > { %332 = vrot.lane.b32.xlu0 %v329_v47, %s605_s27  ;;  %v146_v54 = vpop.permute.xlu1 %145  ;;  %v151_v61 = vmul.f32 0.020473272, %v149_v58 }
  0xc9   : > { %v150_v2 = vadd.f32 %v146_v54, %v142_v59 }
  0xca   : > { %219 = vrot.lane.b32.xlu2 %v215_v48, %s609_s2 }
  0xcb   : > { %v152_v0 = vmul.f32 0.020473272, %v150_v2 }
  0xd2   : > { %351 = vrot.lane.b32.xlu2 %v348_v50, %s605_s27 }
 0x108   : > { %v258_v53 = vpop.permute.xlu2 %257 }
 0x11c   : > { %v331_v55 = vpop.permute.xlu2 %330 }
 0x124   : > { %v220_v63 = vpop.permute.xlu2 %219 }
 0x125   : > { %v225_v3 = vadd.f32 %v220_v63, %v151_v61 }
 0x129   : > { %v256_v60 = vpop.permute.xlu1 %255 }
 0x12a   : > { %v291_v62 = vpop.permute.xlu0 %290  ;;  %v261_v5 = vadd.f32 %v256_v60, %v225_v3 }
 0x12c   : > { %v296_v20 = vadd.f32 %v291_v62, %v261_v5  ;;  %v352_v13 = vpop.permute.xlu2 %351 }
 0x12e   : > { %v336_v1 = vadd.f32 %v331_v55, %v296_v20 }
 0x131   : > { %v293_v6 = vpop.permute.xlu1 %292 }
 0x132   : > { %v222_v7 = vpop.permute.xlu0 %221 }
 0x133   : > { %v226_v8 = vadd.f32 %v222_v7, %v152_v0 }
 0x135   : > { %v262_v9 = vadd.f32 %v258_v53, %v226_v8 }
 0x137   : > { %v297_v10 = vadd.f32 %v293_v6, %v262_v9 }
 0x139   : > { %v350_v22 = vpop.permute.xlu1 %349 }
 0x13a   : > { %v355_v11 = vadd.f32 %v350_v22, %v336_v1  ;;  %v333_v12 = vpop.permute.xlu0 %332 }
 0x13b   : > { %v337_v14 = vadd.f32 %v333_v12, %v297_v10 }
 0x13c   : > { %358 = vst.msk [vmem:[%s672_s26] sm:$0xff] %vm357_vm4, %v355_v11 }
 0x13d   : > { %v356_v17 = vadd.f32 %v352_v13, %v337_v14 }
 0x13f   : > { %359 = vst.msk [vmem:[%s672_s26 + $0x8] sm:$0xff] %vm357_vm4, %v356_v17 }
 0x140   : > { %466 = dma.vmem_to_hbm [thread:$0]  (%p660_p7), %s376_s13, 256, %s378_s18, %s361_s8, %s611_s19, %s611_s19, %s612_s20  }
 0x141 PF: > { %p472_p9 = scmp.ge.s32.totalorder %s602_s9, 1  ;;  %s392_s21 = sand.u32 1, %s590_s6  }
 0x142   : > { %s393_s22 = scalar_lea.sflag [#allocation5], %s392_s21 }
 0x143   : > { %p469_p10 = pnand %p472_p9, %p653_p6 }
 0x145   : > { %p470_p11 = pneg %p469_p10 }
 0x147   : > { %585 = dma.done.wait (%p470_p11), %s393_s22, 256  }
 0x148   : > { %587 = vsyncadd (%p470_p11), %s393_s22, 4294967040  ;;  %s14_s9 = sadd.s32 1, %s602_s9   ;;  %s812_s6 = smov %s594_s7 }
 0x149   : > { %p11_p12 = scmp.ge.s32.totalorder %s14_s9, 7   ;;  %s813_s7 = smov %s658_s15 }
 0x14a   : > { %s814_s8 = smov %s816_s10 }
 0x14b   :  { %13 = sbr.rel (!%p11_p12) target bundleno = 3 (0x3), region = 67 }
 0x150   :  { %399 = vsyncpa [#allocation5], 1 }
 0x151   :  { %401 = vsyncpa [#allocation5 + $0x1], 1 }
 0x152   :  { %402 = vsyncmov [#allocation3] }
 0x155   :  { %s403_s14 = vpop.sfrf %402 }
 0x156   :  { %p463_p13 = scmp.ne.s32.totalorder %s403_s14, 0 }
 0x158   :  { %407 = shalt.err (%p463_p13)  }
 0x159   :  { %409 = vsyncmov [#allocation3 + $0x1] }
 0x15c   :  { %s410_s16 = vpop.sfrf %409 }
 0x15d   :  { %p464_p0 = scmp.ne.s32.totalorder %s410_s16, 0 }
 0x15f   :  { %414 = shalt.err (%p464_p0)  }

</bundles_post_ra>
